<compile_context>
chip_gen: v7x
topology: tpu7x:2x2x1
jax: 0.10.0
libtpu: 0.0.40
codegen_flags: <defaults>
</compile_context>

<pallas_src>
import functools
import numpy as np
import jax
import jax.numpy as jnp
from jax.experimental import pallas as pl
from jax.experimental.pallas import tpu as pltpu

NEG_INF = -1e30
_ROW_PAD = 16            # bf16 sublane tile is (16, 128): keep every slab piece 16-row aligned


def _slab_layout(spec):
  """Row layout of a packed bf16 slab. Each piece is padded to a multiple of 16 rows so every
  in-kernel slice starts on a bf16 sublane-tile boundary."""
  layout, off = {}, 0
  for name, r, c in spec:
    layout[name] = (off, r, c)
    off += -(-r // _ROW_PAD) * _ROW_PAD
  width = max(c for _, _, c in spec)
  return layout, off, width


def _weight_spec(F, H, H_pad):
  return [('w_gcn', F, F), ('wcat1', F, F + 1), ('wcat2', F, F + 1),
          ('wh1', F, H), ('wh2', H, H_pad),
          ('b_gcn', 1, F), ('asrc1', 1, F), ('ba1', 1, F),
          ('asrc2', 1, F), ('ba2', 1, F), ('bh1', 1, H), ('bh2', 1, H_pad)]


def _data_spec(N, F, B):
  return [('x', N, F), ('anorm', N, N), ('ae1', N, N), ('ae2', N, N), ('bmask', N, B)]


def _pack_slab(spec, pieces):
  """Pack named f32 pieces into one bf16 slab (computed in f32, cast once at the end)."""
  layout, rows, width = _slab_layout(spec)
  slab = jnp.zeros((rows, width), jnp.float32)
  for name, (off, r, c) in layout.items():
    slab = slab.at[off:off + r, 0:c].set(pieces[name].astype(jnp.float32))
  return slab.astype(jnp.bfloat16)


def _encoder_kernel(data_ref, wpack_ref, out_ref, *,
                    in_dim, hidden_dim, n_nodes, n_graphs, out_rows, out_cols):
  f32, bf16 = jnp.float32, jnp.bfloat16
  F, H, N, B = in_dim, hidden_dim, n_nodes, n_graphs
  w_layout, _, _ = _slab_layout(_weight_spec(F, H, out_cols))
  d_layout, _, _ = _slab_layout(_data_spec(N, F, B))

  data = data_ref[...]        # one bf16 data slab (x, a_norm, masked edge-attn x2, bmask)
  wp = wpack_ref[...]         # one bf16 weight slab

  def dv(name):               # static, sublane-tile-aligned view into the data slab
    off, r, c = d_layout[name]
    return data[off:off + r, 0:c]

  def pv(name):               # static, sublane-tile-aligned view into the weight slab
    off, r, c = w_layout[name]
    return wp[off:off + r, 0:c]

  x = dv('x')                               # (N, F)  bf16
  anorm = dv('anorm')                       # (N, N)  bf16, D^-1/2 (A+I) D^-1/2
  ae1 = dv('ae1').astype(f32)               # (N, N)  edge-attn term, adj mask folded (-1e30 off-edge)
  ae2 = dv('ae2').astype(f32)
  bmask = dv('bmask')                       # (N, B)  bf16 one-hot node->graph

  # ---------------- layer 0: GCNConv + ReLU (a_norm precomputed host-side) --------------
  # TODO(synk): the PyTorch module passes multi-dim data.edge_attr as GCNConv edge_weight,
  # which is ill-typed in PyG; unit edge weights are used here.
  h = jnp.dot(x, pv('w_gcn'), preferred_element_type=f32)                  # bf16 MXU, f32 acc
  x0 = jnp.dot(anorm, h.astype(bf16), preferred_element_type=f32) + pv('b_gcn')
  x0 = jnp.maximum(x0, 0.0)                                                # (N, F) f32

  def gat(xin, wcat, asrc_comb, bias, alpha_e):
    xin_b = xin.astype(bf16)
    # xl and the dst-attention column from ONE fused projection [W | W @ a_dst^T].
    # (At realistic F >= 128, pad the xl block to a 128-lane multiple so both slices are
    #  lane-tile aligned; at F=16 there is nothing to align.)
    xl_cat = jnp.dot(xin_b, wcat, preferred_element_type=f32)              # (N, F+1)
    xl = xl_cat[:, 0:F]                                                    # (N, F)   f32
    a_dst = xl_cat[:, F:F + 1]                                             # (N, 1)   indexed by dst
    # src attention folded through W host-side (asrc_comb = a_src @ W^T): depends only on
    # xin, not on xl_cat, so it is off the serial critical path of the fused projection.
    a_src = jax.lax.dot_general(asrc_comb, xin_b, (((1,), (1,)), ((), ())),
                                preferred_element_type=f32)                # (1, N)   indexed by src
    logits = a_dst + a_src + alpha_e          # adjacency mask pre-folded: off-edge = -1e30
    logits = jnp.where(logits > 0, logits, 0.2 * logits)                   # leaky_relu(0.2), f32
    m = jnp.max(logits, axis=1, keepdims=True)
    p = jnp.exp(logits - m)                   # off-edge entries underflow to exactly 0 in f32
    # approx reciprocal rides the EUP slot; its ~1e-3 error is below bf16 quantization of alpha.
    inv = pl.reciprocal(jnp.sum(p, axis=1, keepdims=True), approx=True)    # self-loops => sum > 0
    alpha = (p * inv).astype(bf16)
    return jnp.dot(alpha, xl.astype(bf16), preferred_element_type=f32) + bias

  # Gated skip z*x + (1-z)*x is algebraically the identity -> folded away
  # (fc_1 / fc_2 / mol_bias have no effect on this forward pass).
  x1 = jnp.maximum(gat(x0, pv('wcat1'), pv('asrc1'), pv('ba1'), ae1), 0.0)   # GAT1 + ReLU
  x2 = gat(x1, pv('wcat2'), pv('asrc2'), pv('ba2'), ae2)                     # GAT2 (no ReLU)

  # ---------------- global max pool per graph -------------------------------------------
  # Static unroll: B is tiny here. For large B, switch to lax.fori_loop writing rows into a
  # (out_rows, F) VMEM scratch to bound live ranges / vreg pressure.
  rows = []
  for b in range(B):
    col = bmask[:, b:b + 1]
    rows.append(jnp.max(jnp.where(col > 0, x2, NEG_INF), axis=0, keepdims=True))
  for _ in range(out_rows - B):
    rows.append(jnp.zeros((1, F), f32))       # padding rows for the lane/sublane-dense output
  pooled = jnp.concatenate(rows, axis=0)                                    # (out_rows, F)

  # ---------------- fc_g1 -> ReLU -> dropout(identity at inference) -> fc_g2 -------------
  h1 = jnp.maximum(
      jnp.dot(pooled.astype(bf16), pv('wh1'), preferred_element_type=f32) + pv('bh1'), 0.0)
  out_ref[...] = jnp.dot(h1.astype(bf16), pv('wh2'), preferred_element_type=f32) + pv('bh2')


def drug_encoder_forward(x, adj, e_dense, bmask, params, hidden_dim):
  n, f = x.shape
  b = bmask.shape[1]
  hd = hidden_dim
  out_rows = max(8, -(-b // 8) * 8)            # sublane-aligned output rows
  out_cols = max(128, -(-hd // 128) * 128)     # lane-dense output columns

  # ---- host-side precompute of everything that does not depend on x ----
  deg_r = jnp.sum(adj, axis=1, keepdims=True)            # degree incl. self loop (>= 1)
  deg_c = jnp.sum(adj, axis=0, keepdims=True)
  a_norm = adj * jax.lax.rsqrt(deg_r) * jax.lax.rsqrt(deg_c)
  v1 = params['we1'] @ params['ae1'][0]                  # (edge_dim,)
  v2 = params['we2'] @ params['ae2'][0]
  alpha_e1 = jnp.einsum('kij,k->ij', e_dense, v1)        # (N, N) edge-attention term, layer 1
  alpha_e2 = jnp.einsum('kij,k->ij', e_dense, v2)        # (N, N) edge-attention term, layer 2
  # Fold the adjacency mask into the edge-attention terms: the kernel never sees adj.
  # (Self loops guarantee a nonzero softmax denominator; exp(leaky(-1e30)) == 0 in f32.)
  ae1m = jnp.where(adj > 0, alpha_e1, NEG_INF)
  ae2m = jnp.where(adj > 0, alpha_e2, NEG_INF)

  # All tensor inputs in one bf16 slab -> 2 input DMAs total at this (latency-bound) size.
  data_slab = _pack_slab(_data_spec(n, f, b),
                         dict(x=x, anorm=a_norm, ae1=ae1m, ae2=ae2m, bmask=bmask))

  weight_pieces = dict(
      w_gcn=params['w_gcn'],
      # Fuse the GAT dst-attention vector into the projection: [W | W @ a_dst^T]
      wcat1=jnp.concatenate([params['wa1'], params['wa1'] @ params['adst1'].T], axis=1),
      wcat2=jnp.concatenate([params['wa2'], params['wa2'] @ params['adst2'].T], axis=1),
      wh1=params['wh1'],
      wh2=jnp.pad(params['wh2'], ((0, 0), (0, out_cols - hd))),   # lane-dense head output
      b_gcn=params['b_gcn'],
      asrc1=params['asrc1'] @ params['wa1'].T,                    # src attention folded through W
      ba1=params['ba1'],
      asrc2=params['asrc2'] @ params['wa2'].T,
      ba2=params['ba2'],
      bh1=params['bh1'],
      bh2=jnp.pad(params['bh2'], ((0, 0), (0, out_cols - hd))),
  )
  wpack = _pack_slab(_weight_spec(f, hd, out_cols), weight_pieces)

  kernel = functools.partial(
      _encoder_kernel, in_dim=f, hidden_dim=hd, n_nodes=n, n_graphs=b,
      out_rows=out_rows, out_cols=out_cols)
  # Realistic-size path: per-layer dst-row-parallel grids (dimension_semantics=("parallel",...))
  # streaming the (N,N) bf16 slabs as BlockSpec((TILE_N, N), ...) row slabs with an explicit
  # vmem_limit_bytes — required to fit v7x's 64 MiB VMEM and to use both v7x TensorCores.
  # Not needed (and not tile-able) at N=12.
  out = pl.pallas_call(
      kernel,
      out_shape=jax.ShapeDtypeStruct((out_rows, out_cols), jnp.float32),
      in_specs=[pl.BlockSpec(memory_space=pltpu.MemorySpace.VMEM)] * 2,
      out_specs=pl.BlockSpec(memory_space=pltpu.MemorySpace.VMEM),
  )(data_slab, wpack)
  return out[:b, :hd]


def reference_forward(x, adj, e_dense, bmask, params):
  """Pure-JAX f32 reference with identical dense semantics (independent of the precompute path)."""
  deg_r = adj.sum(1, keepdims=True)
  deg_c = adj.sum(0, keepdims=True)
  a_norm = adj / (jnp.sqrt(deg_r) * jnp.sqrt(deg_c))
  x = jnp.maximum(a_norm @ (x @ params['w_gcn']) + params['b_gcn'], 0.0)

  def gat(xin, w, asrc, adst, we, ae, bias):
    xl = xin @ w
    a_dst = (xl * adst).sum(1, keepdims=True)
    a_src = (xl * asrc).sum(1, keepdims=True).T
    v = we @ ae[0]
    alpha_e = jnp.einsum('kij,k->ij', e_dense, v)
    logits = a_dst + a_src + alpha_e
    logits = jnp.where(logits > 0, logits, 0.2 * logits)
    logits = jnp.where(adj > 0, logits, NEG_INF)
    p = jnp.exp(logits - logits.max(1, keepdims=True)) * adj
    alpha = p / p.sum(1, keepdims=True)
    return alpha @ xl + bias

  # gated skip z*x + (1-z)*x is the identity -> no-op
  x = jnp.maximum(gat(x, params['wa1'], params['asrc1'], params['adst1'],
                      params['we1'], params['ae1'], params['ba1']), 0.0)
  x = gat(x, params['wa2'], params['asrc2'], params['adst2'],
          params['we2'], params['ae2'], params['ba2'])
  pooled = jnp.max(jnp.where(bmask.T[:, :, None] > 0, x[None], NEG_INF), axis=1)
  h1 = jnp.maximum(pooled @ params['wh1'] + params['bh1'], 0.0)
  return h1 @ params['wh2'] + params['bh2']


if __name__ == "__main__":
  IN_DIM, EDGE_DIM, HIDDEN = 16, 4, 32
  nodes_per_graph = [6, 6]
  B = len(nodes_per_graph)
  N = sum(nodes_per_graph)

  key = jax.random.PRNGKey(0)
  keys = iter(jax.random.split(key, 40))

  # Two small undirected ring graphs (block-diagonal -> one batched graph).
  src, dst, off = [], [], 0
  for ng in nodes_per_graph:
    for i in range(ng):
      a_, b_ = off + i, off + (i + 1) % ng
      src += [a_, b_]
      dst += [b_, a_]
    off += ng
  src, dst = np.array(src), np.array(dst)
  E = len(src)

  x = jax.random.normal(next(keys), (N, IN_DIM), jnp.float32)
  edge_attr = jax.random.normal(next(keys), (E, EDGE_DIM), jnp.float32)

  # Dense adjacency adj[dst, src] with self loops.
  adj_np = np.zeros((N, N), np.float32)
  adj_np[dst, src] = 1.0
  adj_np[np.arange(N), np.arange(N)] = 1.0
  # Dense edge attrs [k, dst, src]; self-loop attrs = mean of incoming edge attrs (PyG 'mean').
  ea = np.asarray(edge_attr)
  e_np = np.zeros((EDGE_DIM, N, N), np.float32)
  e_np[:, dst, src] = ea.T
  for i in range(N):
    inc = (dst == i)
    if inc.any():
      e_np[:, i, i] = ea[inc].mean(axis=0)
  # Node -> graph one-hot, (N, B).
  batch = np.concatenate([np.full(ng, g) for g, ng in enumerate(nodes_per_graph)])
  bmask_np = np.zeros((N, B), np.float32)
  bmask_np[np.arange(N), batch] = 1.0

  def unif(shape, scale=0.3):
    return jax.random.uniform(next(keys), shape, jnp.float32, -scale, scale)

  # fc_1 / fc_2 / mol_bias omitted: the gated skip z*x + (1-z)*x is the identity, so they
  # are provably dead in the forward pass.
  params = dict(
      w_gcn=unif((IN_DIM, IN_DIM)), b_gcn=unif((1, IN_DIM)),
      wa1=unif((IN_DIM, IN_DIM)), asrc1=unif((1, IN_DIM)), adst1=unif((1, IN_DIM)),
      we1=unif((EDGE_DIM, IN_DIM)), ae1=unif((1, IN_DIM)), ba1=unif((1, IN_DIM)),
      wa2=unif((IN_DIM, IN_DIM)), asrc2=unif((1, IN_DIM)), adst2=unif((1, IN_DIM)),
      we2=unif((EDGE_DIM, IN_DIM)), ae2=unif((1, IN_DIM)), ba2=unif((1, IN_DIM)),
      wh1=unif((IN_DIM, HIDDEN)), bh1=unif((1, HIDDEN)),
      wh2=unif((HIDDEN, HIDDEN)), bh2=unif((1, HIDDEN)),
  )

  adj = jnp.asarray(adj_np)
  e_dense = jnp.asarray(e_np)
  bmask = jnp.asarray(bmask_np)

  out = drug_encoder_forward(x, adj, e_dense, bmask, params, HIDDEN)
  out = jax.block_until_ready(out)
  assert out.shape == (B, HIDDEN)

  ref = reference_forward(x, adj, e_dense, bmask, params)
  # Tolerance reflects bf16 HBM streams / MXU operands (f32 accumulation) vs the f32 reference.
  if not bool(jnp.allclose(out, ref, atol=1e-1, rtol=5e-2)):
    raise AssertionError(
        "Pallas kernel output does not match JAX reference; max abs err = "
        f"{float(jnp.max(jnp.abs(out - ref)))}")
  print("KERNEL_OK")
</pallas_src>

<mosaic_0001>
module attributes {stable_mosaic.version = 11 : i64} {
  func.func @_encoder_kernel(%arg0: memref<80x16xbf16, #tpu.memory_space<vmem>>, %arg1: memref<208x128xbf16, #tpu.memory_space<vmem>>, %arg2: memref<8x128xf32, #tpu.memory_space<vmem>>) attributes {dimension_semantics = [], scalar_prefetch = 0 : i64, scratch_operands = 0 : i64, tpu.core_type = #tpu.core_type<tc>} {
    %c0 = arith.constant 0 : index
    %c0_0 = arith.constant 0 : index
    %0 = vector.load %arg0[%c0, %c0_0] : memref<80x16xbf16, #tpu.memory_space<vmem>>, vector<80x16xbf16>
    %c0_1 = arith.constant 0 : index
    %c0_2 = arith.constant 0 : index
    %1 = vector.load %arg1[%c0_1, %c0_2] : memref<208x128xbf16, #tpu.memory_space<vmem>>, vector<208x128xbf16>
    %2 = vector.extract_strided_slice %0 {offsets = [0, 0], sizes = [12, 16], strides = [1, 1]} : vector<80x16xbf16> to vector<12x16xbf16>
    %3 = vector.extract_strided_slice %0 {offsets = [16, 0], sizes = [12, 12], strides = [1, 1]} : vector<80x16xbf16> to vector<12x12xbf16>
    %4 = vector.extract_strided_slice %0 {offsets = [32, 0], sizes = [12, 12], strides = [1, 1]} : vector<80x16xbf16> to vector<12x12xbf16>
    %5 = arith.extf %4 : vector<12x12xbf16> to vector<12x12xf32>
    %6 = vector.extract_strided_slice %0 {offsets = [48, 0], sizes = [12, 12], strides = [1, 1]} : vector<80x16xbf16> to vector<12x12xbf16>
    %7 = arith.extf %6 : vector<12x12xbf16> to vector<12x12xf32>
    %8 = vector.extract_strided_slice %0 {offsets = [64, 0], sizes = [12, 2], strides = [1, 1]} : vector<80x16xbf16> to vector<12x2xbf16>
    %9 = vector.extract_strided_slice %1 {offsets = [0, 0], sizes = [16, 16], strides = [1, 1]} : vector<208x128xbf16> to vector<16x16xbf16>
    %cst = arith.constant dense<0.000000e+00> : vector<12x16xf32>
    %10 = tpu.matmul %2, %9, %cst {dimension_numbers = #tpu.dot_dimension_numbers<[1], [0], [0], [1], [0, 0, 1, 1], [], []>} : vector<12x16xbf16>, vector<16x16xbf16>, vector<12x16xf32> -> vector<12x16xf32>
    %11 = arith.truncf %10 : vector<12x16xf32> to vector<12x16xbf16>
    %cst_3 = arith.constant dense<0.000000e+00> : vector<12x16xf32>
    %12 = tpu.matmul %3, %11, %cst_3 {dimension_numbers = #tpu.dot_dimension_numbers<[1], [0], [0], [1], [0, 0, 1, 1], [], []>} : vector<12x12xbf16>, vector<12x16xbf16>, vector<12x16xf32> -> vector<12x16xf32>
    %13 = vector.extract_strided_slice %1 {offsets = [96, 0], sizes = [1, 16], strides = [1, 1]} : vector<208x128xbf16> to vector<1x16xbf16>
    %14 = arith.extf %13 : vector<1x16xbf16> to vector<1x16xf32>
    %15 = vector.broadcast %14 : vector<1x16xf32> to vector<12x16xf32>
    %16 = arith.addf %12, %15 : vector<12x16xf32>
    %cst_4 = arith.constant 0.000000e+00 : f32
    %17 = vector.broadcast %cst_4 : f32 to vector<12x16xf32>
    %18 = arith.maximumf %16, %17 : vector<12x16xf32>
    %19 = vector.extract_strided_slice %1 {offsets = [16, 0], sizes = [16, 17], strides = [1, 1]} : vector<208x128xbf16> to vector<16x17xbf16>
    %20 = vector.extract_strided_slice %1 {offsets = [112, 0], sizes = [1, 16], strides = [1, 1]} : vector<208x128xbf16> to vector<1x16xbf16>
    %21 = vector.extract_strided_slice %1 {offsets = [128, 0], sizes = [1, 16], strides = [1, 1]} : vector<208x128xbf16> to vector<1x16xbf16>
    %22 = arith.truncf %18 : vector<12x16xf32> to vector<12x16xbf16>
    %cst_5 = arith.constant dense<0.000000e+00> : vector<12x17xf32>
    %23 = tpu.matmul %22, %19, %cst_5 {dimension_numbers = #tpu.dot_dimension_numbers<[1], [0], [0], [1], [0, 0, 1, 1], [], []>} : vector<12x16xbf16>, vector<16x17xbf16>, vector<12x17xf32> -> vector<12x17xf32>
    %24 = vector.extract_strided_slice %23 {offsets = [0, 0], sizes = [12, 16], strides = [1, 1]} : vector<12x17xf32> to vector<12x16xf32>
    %25 = vector.extract_strided_slice %23 {offsets = [0, 16], sizes = [12, 1], strides = [1, 1]} : vector<12x17xf32> to vector<12x1xf32>
    %cst_6 = arith.constant dense<0.000000e+00> : vector<1x12xf32>
    %26 = tpu.matmul %20, %22, %cst_6 {dimension_numbers = #tpu.dot_dimension_numbers<[1], [1], [0], [0], [0, 0, 1, 0], [], []>} : vector<1x16xbf16>, vector<12x16xbf16>, vector<1x12xf32> -> vector<1x12xf32>
    %27 = vector.broadcast %25 : vector<12x1xf32> to vector<12x12xf32>
    %28 = vector.broadcast %26 : vector<1x12xf32> to vector<12x12xf32>
    %29 = arith.addf %27, %28 : vector<12x12xf32>
    %30 = arith.addf %29, %5 : vector<12x12xf32>
    %cst_7 = arith.constant 0.000000e+00 : f32
    %31 = vector.broadcast %cst_7 : f32 to vector<12x12xf32>
    %32 = arith.cmpf ogt, %30, %31 : vector<12x12xf32>
    %cst_8 = arith.constant 2.000000e-01 : f32
    %33 = vector.broadcast %cst_8 : f32 to vector<12x12xf32>
    %34 = arith.mulf %33, %30 : vector<12x12xf32>
    %35 = arith.select %32, %30, %34 : vector<12x12xi1>, vector<12x12xf32>
    %cst_9 = arith.constant dense<0xFF800000> : vector<12xf32>
    %36 = vector.multi_reduction <maximumf>, %35, %cst_9 [1] : vector<12x12xf32> to vector<12xf32>
    %37 = vector.shape_cast %36 : vector<12xf32> to vector<12x1xf32>
    %38 = vector.broadcast %37 : vector<12x1xf32> to vector<12x12xf32>
    %39 = arith.subf %35, %38 : vector<12x12xf32>
    %40 = math.exp %39 : vector<12x12xf32>
    %cst_10 = arith.constant dense<0.000000e+00> : vector<12xf32>
    %41 = vector.multi_reduction <add>, %40, %cst_10 [1] : vector<12x12xf32> to vector<12xf32>
    %42 = vector.shape_cast %41 : vector<12xf32> to vector<12x1xf32>
    %43 = tpu.reciprocal %42 {approx = true} : vector<12x1xf32> -> vector<12x1xf32>
    %44 = vector.broadcast %43 : vector<12x1xf32> to vector<12x12xf32>
    %45 = arith.mulf %40, %44 : vector<12x12xf32>
    %46 = arith.truncf %45 : vector<12x12xf32> to vector<12x12xbf16>
    %47 = arith.truncf %24 : vector<12x16xf32> to vector<12x16xbf16>
    %cst_11 = arith.constant dense<0.000000e+00> : vector<12x16xf32>
    %48 = tpu.matmul %46, %47, %cst_11 {dimension_numbers = #tpu.dot_dimension_numbers<[1], [0], [0], [1], [0, 0, 1, 1], [], []>} : vector<12x12xbf16>, vector<12x16xbf16>, vector<12x16xf32> -> vector<12x16xf32>
    %49 = arith.extf %21 : vector<1x16xbf16> to vector<1x16xf32>
    %50 = vector.broadcast %49 : vector<1x16xf32> to vector<12x16xf32>
    %51 = arith.addf %48, %50 : vector<12x16xf32>
    %cst_12 = arith.constant 0.000000e+00 : f32
    %52 = vector.broadcast %cst_12 : f32 to vector<12x16xf32>
    %53 = arith.maximumf %51, %52 : vector<12x16xf32>
    %54 = vector.extract_strided_slice %1 {offsets = [32, 0], sizes = [16, 17], strides = [1, 1]} : vector<208x128xbf16> to vector<16x17xbf16>
    %55 = vector.extract_strided_slice %1 {offsets = [144, 0], sizes = [1, 16], strides = [1, 1]} : vector<208x128xbf16> to vector<1x16xbf16>
    %56 = vector.extract_strided_slice %1 {offsets = [160, 0], sizes = [1, 16], strides = [1, 1]} : vector<208x128xbf16> to vector<1x16xbf16>
    %57 = arith.truncf %53 : vector<12x16xf32> to vector<12x16xbf16>
    %cst_13 = arith.constant dense<0.000000e+00> : vector<12x17xf32>
    %58 = tpu.matmul %57, %54, %cst_13 {dimension_numbers = #tpu.dot_dimension_numbers<[1], [0], [0], [1], [0, 0, 1, 1], [], []>} : vector<12x16xbf16>, vector<16x17xbf16>, vector<12x17xf32> -> vector<12x17xf32>
    %59 = vector.extract_strided_slice %58 {offsets = [0, 0], sizes = [12, 16], strides = [1, 1]} : vector<12x17xf32> to vector<12x16xf32>
    %60 = vector.extract_strided_slice %58 {offsets = [0, 16], sizes = [12, 1], strides = [1, 1]} : vector<12x17xf32> to vector<12x1xf32>
    %cst_14 = arith.constant dense<0.000000e+00> : vector<1x12xf32>
    %61 = tpu.matmul %55, %57, %cst_14 {dimension_numbers = #tpu.dot_dimension_numbers<[1], [1], [0], [0], [0, 0, 1, 0], [], []>} : vector<1x16xbf16>, vector<12x16xbf16>, vector<1x12xf32> -> vector<1x12xf32>
    %62 = vector.broadcast %60 : vector<12x1xf32> to vector<12x12xf32>
    %63 = vector.broadcast %61 : vector<1x12xf32> to vector<12x12xf32>
    %64 = arith.addf %62, %63 : vector<12x12xf32>
    %65 = arith.addf %64, %7 : vector<12x12xf32>
    %cst_15 = arith.constant 0.000000e+00 : f32
    %66 = vector.broadcast %cst_15 : f32 to vector<12x12xf32>
    %67 = arith.cmpf ogt, %65, %66 : vector<12x12xf32>
    %cst_16 = arith.constant 2.000000e-01 : f32
    %68 = vector.broadcast %cst_16 : f32 to vector<12x12xf32>
    %69 = arith.mulf %68, %65 : vector<12x12xf32>
    %70 = arith.select %67, %65, %69 : vector<12x12xi1>, vector<12x12xf32>
    %cst_17 = arith.constant dense<0xFF800000> : vector<12xf32>
    %71 = vector.multi_reduction <maximumf>, %70, %cst_17 [1] : vector<12x12xf32> to vector<12xf32>
    %72 = vector.shape_cast %71 : vector<12xf32> to vector<12x1xf32>
    %73 = vector.broadcast %72 : vector<12x1xf32> to vector<12x12xf32>
    %74 = arith.subf %70, %73 : vector<12x12xf32>
    %75 = math.exp %74 : vector<12x12xf32>
    %cst_18 = arith.constant dense<0.000000e+00> : vector<12xf32>
    %76 = vector.multi_reduction <add>, %75, %cst_18 [1] : vector<12x12xf32> to vector<12xf32>
    %77 = vector.shape_cast %76 : vector<12xf32> to vector<12x1xf32>
    %78 = tpu.reciprocal %77 {approx = true} : vector<12x1xf32> -> vector<12x1xf32>
    %79 = vector.broadcast %78 : vector<12x1xf32> to vector<12x12xf32>
    %80 = arith.mulf %75, %79 : vector<12x12xf32>
    %81 = arith.truncf %80 : vector<12x12xf32> to vector<12x12xbf16>
    %82 = arith.truncf %59 : vector<12x16xf32> to vector<12x16xbf16>
    %cst_19 = arith.constant dense<0.000000e+00> : vector<12x16xf32>
    %83 = tpu.matmul %81, %82, %cst_19 {dimension_numbers = #tpu.dot_dimension_numbers<[1], [0], [0], [1], [0, 0, 1, 1], [], []>} : vector<12x12xbf16>, vector<12x16xbf16>, vector<12x16xf32> -> vector<12x16xf32>
    %84 = arith.extf %56 : vector<1x16xbf16> to vector<1x16xf32>
    %85 = vector.broadcast %84 : vector<1x16xf32> to vector<12x16xf32>
    %86 = arith.addf %83, %85 : vector<12x16xf32>
    %87 = vector.extract_strided_slice %8 {offsets = [0, 0], sizes = [12, 1], strides = [1, 1]} : vector<12x2xbf16> to vector<12x1xbf16>
    %cst_20 = arith.constant 0.000000e+00 : bf16
    %88 = vector.broadcast %cst_20 : bf16 to vector<12x1xbf16>
    %89 = arith.cmpf ogt, %87, %88 : vector<12x1xbf16>
    %cst_21 = arith.constant -1.000000e+30 : f32
    %90 = vector.shape_cast %89 : vector<12x1xi1> to vector<12x1xi1>
    %91 = vector.broadcast %90 : vector<12x1xi1> to vector<12x16xi1>
    %92 = vector.broadcast %cst_21 : f32 to vector<12x16xf32>
    %93 = arith.select %91, %86, %92 : vector<12x16xi1>, vector<12x16xf32>
    %cst_22 = arith.constant dense<0xFF800000> : vector<16xf32>
    %94 = vector.multi_reduction <maximumf>, %93, %cst_22 [0] : vector<12x16xf32> to vector<16xf32>
    %95 = vector.shape_cast %94 : vector<16xf32> to vector<1x16xf32>
    %96 = vector.extract_strided_slice %8 {offsets = [0, 1], sizes = [12, 1], strides = [1, 1]} : vector<12x2xbf16> to vector<12x1xbf16>
    %cst_23 = arith.constant 0.000000e+00 : bf16
    %97 = vector.broadcast %cst_23 : bf16 to vector<12x1xbf16>
    %98 = arith.cmpf ogt, %96, %97 : vector<12x1xbf16>
    %cst_24 = arith.constant -1.000000e+30 : f32
    %99 = vector.shape_cast %98 : vector<12x1xi1> to vector<12x1xi1>
    %100 = vector.broadcast %99 : vector<12x1xi1> to vector<12x16xi1>
    %101 = vector.broadcast %cst_24 : f32 to vector<12x16xf32>
    %102 = arith.select %100, %86, %101 : vector<12x16xi1>, vector<12x16xf32>
    %cst_25 = arith.constant dense<0xFF800000> : vector<16xf32>
    %103 = vector.multi_reduction <maximumf>, %102, %cst_25 [0] : vector<12x16xf32> to vector<16xf32>
    %104 = vector.shape_cast %103 : vector<16xf32> to vector<1x16xf32>
    %cst_26 = arith.constant 0.000000e+00 : f32
    %105 = vector.broadcast %cst_26 : f32 to vector<1x16xf32>
    %cst_27 = arith.constant 0.000000e+00 : f32
    %106 = vector.broadcast %cst_27 : f32 to vector<1x16xf32>
    %cst_28 = arith.constant 0.000000e+00 : f32
    %107 = vector.broadcast %cst_28 : f32 to vector<1x16xf32>
    %cst_29 = arith.constant 0.000000e+00 : f32
    %108 = vector.broadcast %cst_29 : f32 to vector<1x16xf32>
    %cst_30 = arith.constant 0.000000e+00 : f32
    %109 = vector.broadcast %cst_30 : f32 to vector<1x16xf32>
    %cst_31 = arith.constant 0.000000e+00 : f32
    %110 = vector.broadcast %cst_31 : f32 to vector<1x16xf32>
    %111 = tpu.concatenate %95, %104, %105, %106, %107, %108, %109, %110 in 0 : vector<1x16xf32>, vector<1x16xf32>, vector<1x16xf32>, vector<1x16xf32>, vector<1x16xf32>, vector<1x16xf32>, vector<1x16xf32>, vector<1x16xf32> -> vector<8x16xf32>
    %112 = arith.truncf %111 : vector<8x16xf32> to vector<8x16xbf16>
    %113 = vector.extract_strided_slice %1 {offsets = [48, 0], sizes = [16, 32], strides = [1, 1]} : vector<208x128xbf16> to vector<16x32xbf16>
    %cst_32 = arith.constant dense<0.000000e+00> : vector<8x32xf32>
    %114 = tpu.matmul %112, %113, %cst_32 {dimension_numbers = #tpu.dot_dimension_numbers<[1], [0], [0], [1], [0, 0, 1, 1], [], []>} : vector<8x16xbf16>, vector<16x32xbf16>, vector<8x32xf32> -> vector<8x32xf32>
    %115 = vector.extract_strided_slice %1 {offsets = [176, 0], sizes = [1, 32], strides = [1, 1]} : vector<208x128xbf16> to vector<1x32xbf16>
    %116 = arith.extf %115 : vector<1x32xbf16> to vector<1x32xf32>
    %117 = vector.broadcast %116 : vector<1x32xf32> to vector<8x32xf32>
    %118 = arith.addf %114, %117 : vector<8x32xf32>
    %cst_33 = arith.constant 0.000000e+00 : f32
    %119 = vector.broadcast %cst_33 : f32 to vector<8x32xf32>
    %120 = arith.maximumf %118, %119 : vector<8x32xf32>
    %121 = arith.truncf %120 : vector<8x32xf32> to vector<8x32xbf16>
    %122 = vector.extract_strided_slice %1 {offsets = [64, 0], sizes = [32, 128], strides = [1, 1]} : vector<208x128xbf16> to vector<32x128xbf16>
    %cst_34 = arith.constant dense<0.000000e+00> : vector<8x128xf32>
    %123 = tpu.matmul %121, %122, %cst_34 {dimension_numbers = #tpu.dot_dimension_numbers<[1], [0], [0], [1], [0, 0, 1, 1], [], []>} : vector<8x32xbf16>, vector<32x128xbf16>, vector<8x128xf32> -> vector<8x128xf32>
    %124 = vector.extract_strided_slice %1 {offsets = [192, 0], sizes = [1, 128], strides = [1, 1]} : vector<208x128xbf16> to vector<1x128xbf16>
    %125 = arith.extf %124 : vector<1x128xbf16> to vector<1x128xf32>
    %126 = vector.broadcast %125 : vector<1x128xf32> to vector<8x128xf32>
    %127 = arith.addf %123, %126 : vector<8x128xf32>
    %c0_35 = arith.constant 0 : index
    %c0_36 = arith.constant 0 : index
    %128 = vector.load %arg2[%c0_35, %c0_36] : memref<8x128xf32, #tpu.memory_space<vmem>>, vector<8x128xf32>
    tpu.vector_store %arg2[%c0_35, %c0_36], %127 {strides = array<i32>} : memref<8x128xf32, #tpu.memory_space<vmem>>, vector<8x128xf32>,
    return
  }
}

</mosaic_0001>

<bundles_post_ra>
// kernel: tpu_custom_call.1
= control target key start
LH: loop header
LB: loop body
LE: loop exit
PB: predicated region body
PF: predicated region fallthrough
CT: control target
= control target key end

     0   :  { %7 = vsyncpa [#allocation3], 0  ;;  %s1106_s0 = inlined_call_operand.vmem [shape: bf16[80,16], index: 0, kind: input, shape index: {}]   ;;  %s1107_s1 = inlined_call_operand.hbm [shape: bf16[208,128], index: 1, kind: input, shape index: {}]   ;;  %s1108_s2 = inlined_call_operand.hbm [shape: f32[8,128], index: 2, kind: output, shape index: {}]  }
   0x1   :  { %8 = vsyncpa [#allocation4], 0  ;;  %s971_s9 = smov [#allocation2]   ;;  %s923_s13 = scalar_lea.hbm %s1107_s1, 1664 }
   0x2   :  { %s16_s10 = sshll.u32 %s971_s9, 4  ;;  %p924_p0 = scmp.ne.s32.totalorder %s1107_s1, %s923_s13  ;;  %s17_s10 = int_to_ptr.vmem [resolvable:$true] %s16_s10 }
   0x3   :  { %p927_p1 = scmp.lt.u32.totalorder %s923_s13, %s1107_s1 }
   0x5   :  { %p929_p2 = pnand %p927_p1, %p924_p0 }
   0x7   :  { %932 = shalt.err (!%p929_p2)
}
   0x8   :  { %s933_s18 = scalar_lea.vmem %s17_s10, 1664  ;;  %p938_p4 = scmp.lt.s32.totalorder %s17_s10, %s17_s10 }
   0x9   :  { %p934_p3 = scmp.ne.s32.totalorder %s17_s10, %s933_s18  ;;  %p939_p5 = scmp.lt.s32.totalorder %s933_s18, %s933_s18 }
   0xb   :  { %p940_p6 = por %p939_p5, %p938_p4 }
   0xd   :  { %p941_p7 = pnand %p940_p6, %p934_p3 }
   0xf   :  { %944 = shalt.err (!%p941_p7)
}
  0x10   :  { %s972_s19 = smov 64   ;;  %s973_s20 = smov 4  }
  0x11   :  { %22 = dma.hbm_to_vmem [thread:$0]  %s1107_s1, 1664, %s17_s10, [#allocation3], %s972_s19, %s972_s19, %s973_s20  }
  0x12   :  { %967 = dma.done.wait [#allocation3], 1664  }
  0x13   :  { %968 = vsyncadd [#allocation3], 4294965632  ;;  %v974_v0 = vmov 0.0   ;;  %vm975_vm0 = vmmov 0   ;;  %v899_v1 = vld [vmem:[#allocation2] sm:$0xff]   ;;  %vm73_vm1 = vcmask 130048   ;;  %v120_v12 = vlaneseq }
  0x14   :  { %824 = vmatprep.subr.bf16.mxu0 %v974_v0  ;;  %826 = vmatprep.mubr.msk.bf16.mxu0 %vm975_vm0, %v974_v0  ;;  %v900_v2 = vld [vmem:[%s1106_s0] sm:$0xff]   ;;  %vm133_vm2 = vcmask 1045504   ;;  %v901_v9 = vld [vmem:[%s1106_s0 + $0x8] sm:$0xff]   ;;  %vm129_vm3 = vcmask 97280   ;;  %v976_v11 = vmov 16   ;;  %v801_v39 = vld [vmem:[%s1106_s0 + $0x10] sm:$0xff]  }
  0x15   :  { %830 = vmatprep.subr.bf16.mxu1 %v974_v0  ;;  %832 = vmatprep.mubr.msk.bf16.mxu1 %vm975_vm0, %v974_v0  ;;  %v902_v10 = vld [vmem:[#allocation2 + $0x8] sm:$0xff]   ;;  %v121_v13 = vshrl.u32 %v120_v12, 7  ;;  %v1029_v14 = vld [vmem:[#allocation2 + $0x30] ss:$16 sps:$4 sm:$0xff]   ;;  %v52_v28 = vld [vmem:[#allocation2 + $0x38] sm:$0xf]  ;;  %v795_v41 = vunpack.c.l.bf16 %v801_v39  ;;  %v796_v45 = vunpack.c.h.bf16 %v801_v39 }
  0x16   :  { %825 = vmatpush3.bf16.msra.mxu0 %v899_v1  ;;  %895 = vset.pattern.permute.xlu0 %v976_v11  ;;  %v119_v15 = vunpack.c.l.bf16 %v1029_v14  ;;  %vm301_vm6 = vcmask 93184   ;;  %s978_s4 = smov 127  }
  0x17   :  { %836 = vmatprep.subr.bf16.mxu0 %v974_v0  ;;  %896 = vset.pattern.permute.xlu1 %v976_v11  ;;  %v1032_v16 = vsub.s32 0, %v121_v13 }
  0x19   :  { %827 = vmatmul.mubr.msk.bf16.vlgmr.msra.gmra.mrb[0].mxu0 %vm73_vm1, %v900_v2  ;;  %v123_v17 = vrot.slane %v119_v15, %v1032_v16 }
  0x1a   :  { %838 = vmatprep.mubr.msk.bf16.mxu0 %vm975_vm0, %v974_v0  ;;  %837 = vmatpush3.bf16.msra.mxu0 %v902_v10  ;;  %v323_v10 = vunpack.c.h.bf16 %v1029_v14  ;;  %v54_v14 = vld [vmem:[#allocation2 + $0x48] sm:$0xf] }
  0x1b   :  { %848 = vmatprep.subr.bf16.mxu0 %v974_v0 }
  0x1c   :  { %v327_v11 = vrot.slane %v323_v10, %v1032_v16 }
  0xec   :  { %v111_v3 = vpop.f32.mrb[0].mxu0 }
  0xed   :  { %v828_v4 = vpop.f32.mrb[1].mxu0 }
  0xee   :  { %v114_v5 = vpop.f32.mrb[2].mxu0 }
  0xef   :  { %v118_v6 = vpack.c.bf16 %v114_v5, %v111_v3  ;;  %v829_v7 = vpop.f32.mrb[3].mxu0 }
  0xf1   :  { %v135_v8 = vsel %vm133_vm2, %v118_v6, 0 }
  0xf2   :  { %831 = vmatpush3.bf16.msra.mxu1 %v135_v8 }
  0xf3   :  { %842 = vmatprep.subr.bf16.mxu1 %v974_v0 }
  0xf5   :  { %833 = vmatmul.mubr.msk.bf16.vlgmr.msra.gmra.mrb[0].mxu1 %vm129_vm3, %v901_v9  ;;  %v903_v9 = vld [vmem:[#allocation2 + $0x10] sm:$0xff]  }
  0xf6   :  { %844 = vmatprep.mubr.msk.bf16.mxu1 %vm975_vm0, %v974_v0 }
 0x1c8   :  { %v171_v18 = vpop.f32.mrb[0].mxu1 }
 0x1c9   :  { %v172_v19 = vadd.f32 %v171_v18, %v123_v17  ;;  %v834_v20 = vpop.f32.mrb[1].mxu1 }
 0x1ca   :  { %v174_v21 = vpop.f32.mrb[2].mxu1 }
 0x1cb   :  { %v175_v22 = vadd.f32 %v174_v21, %v123_v17  ;;  %v835_v23 = vpop.f32.mrb[3].mxu1  ;;  %v178_v24 = vmax.f32 %v172_v19, 0.0 }
 0x1cd   :  { %v179_v25 = vmax.f32 %v175_v22, 0.0 }
 0x1cf   :  { %v180_v26 = vpack.c.bf16 %v179_v25, %v178_v24 }
 0x1d1   :  { %839 = vmatmul.mubr.msk.bf16.vlgmr.msra.gmra.mrb[4].mxu0 %vm73_vm1, %v180_v26  ;;  %v188_v27 = vsel %vm73_vm1, %v180_v26, 0 }
 0x1d2   :  { %843 = vmatpush3.bf16.xpose.msra.mxu1 %v188_v27  ;;  %850 = vmatprep.mubr.msk.bf16.mxu0 %vm975_vm0, %v974_v0 }
 0x1d3   :  { %854 = vmatprep.subr.bf16.mxu1 %v974_v0 }
 0x1d9   :  { %845 = vmatmul.mubr.msk.bf16.vlgmr.msra.gmra.mrb[4].mxu1 %vm73_vm1, %v52_v28 }
 0x1da   :  { %856 = vmatprep.mubr.msk.bf16.mxu1 %vm975_vm0, %v974_v0  ;;  %855 = vmatpush3.bf16.msra.mxu1 %v903_v9 }
 0x1db   :  { %866 = vmatprep.subr.bf16.mxu1 %v974_v0 }
 0x2a4   :  { %v224_v29 = vpop.f32.mrb[4].mxu0 }
 0x2a5   :  { %276 = vperm.xlu0 %895, %v224_v29   ;;  %v840_v30 = vpop.f32.mrb[5].mxu0 }
 0x2a6   :  { %v227_v31 = vpop.f32.mrb[6].mxu0 }
 0x2a7   :  { %v322_v32 = vpack.c.bf16 %v227_v31, %v224_v29  ;;  %v841_v33 = vpop.f32.mrb[7].mxu0 }
 0x2a9   :  { %281 = vperm.xlu0 %895, %v227_v31   ;;  %v332_v34 = vsel %vm133_vm2, %v322_v32, 0 }
 0x2aa   :  { %849 = vmatpush3.bf16.msra.mxu0 %v332_v34  ;;  %v802_v34 = vld [vmem:[%s1106_s0 + $0x18] sm:$0xff]  }
 0x2ab   :  { %860 = vmatprep.subr.bf16.mxu0 %v974_v0 }
 0x2ac   :  { %v268_v35 = vpop.f32.mrb[4].mxu1 }
 0x2ad   :  { %v846_v36 = vpop.f32.mrb[5].mxu1  ;;  %v287_v40 = vrot.slane %v268_v35, %v1032_v16 }
 0x2ae   :  { %v271_v37 = vpop.f32.mrb[6].mxu1  ;;  %v799_v36 = vunpack.c.l.bf16 %v802_v34 }
 0x2af   :  { %v847_v38 = vpop.f32.mrb[7].mxu1 }
 0x324   :  { %v277_v42 = vpop.permute.xlu0 %276 }
 0x325   :  { %v288_v43 = vadd.f32 %v287_v40, %v277_v42 }
 0x327   :  { %v290_v44 = vadd.f32 %v795_v41, %v288_v43 }
 0x328   :  { %v282_v46 = vpop.permute.xlu0 %281 }
 0x329   :  { %v289_v47 = vadd.f32 %v287_v40, %v282_v46  ;;  %vm292_vm4 = vcmp.gt.f32.partialorder %v290_v44, 0.0  ;;  %v294_v48 = vmul.f32 0.2, %v290_v44  ;;  %v800_v40 = vunpack.c.h.bf16 %v802_v34 }
 0x32b   :  { %v291_v49 = vadd.f32 %v796_v45, %v289_v47  ;;  %v296_v50 = vsel %vm292_vm4, %v290_v44, %v294_v48  ;;  %vm592_vm4 = vcmask 125952  }
 0x32c   :  { %v298_v51 = vsel %vm129_vm3, %v296_v50, -inf }
 0x32d   :  { %299 = vmax.xlane.f32.xlu1 %v298_v51  ;;  %vm293_vm5 = vcmp.gt.f32.partialorder %v291_v49, 0.0  ;;  %v295_v52 = vmul.f32 0.2, %v291_v49  ;;  %v38_v51 = vld [vmem:[%s1106_s0 + $0x24] sm:$0xf] }
 0x32e   :  { %vm572_vm9 = vcmp.gt.bf16.partialorder %v38_v51, 0 }
 0x32f   :  { %v297_v53 = vsel %vm293_vm5, %v291_v49, %v295_v52 }
 0x330   :  { %v302_v54 = vsel %vm301_vm6, %v297_v53, -inf }
 0x331   :  { %303 = vmax.xlane.f32.xlu1 %v302_v54 }
 0x3ba   :  { %v300_v55 = vpop.xlane.xlu1 %299 }
 0x3bb   :  { %v305_v56 = vsub.f32 %v296_v50, %v300_v55  ;;  %v977_v50 = vmov 0  }
 0x3bc   :  { %897 = vset.pattern.permute.xlu0 %v977_v50  ;;  %v574_v52 = vsel %vm572_vm9, 65537, %v977_v50  ;;  %vm634_vm9 = vcmask 1043456  }
 0x3bd   :  { %v307_v57 = vmul.f32 1.442695, %v305_v56 }
 0x3be   :  { %v304_v58 = vpop.xlane.xlu1 %303 }
 0x3bf   :  { %907 = vpow2.f32 %v307_v57  ;;  %v306_v59 = vsub.f32 %v297_v53, %v304_v58  ;;  %v576_v53 = vunpack.c.l.b16 %v574_v52 }
 0x3c1   :  { %v309_v60 = vmul.f32 1.442695, %v306_v59  ;;  %vm578_vm10 = vcmp.ne.s32.totalorder %v576_v53, 0 }
 0x3c2   :  { %v580_v54 = vsel %vm578_vm10, 1, %v977_v50  ;;  %vm636_vm10 = vcmask 1044480  }
 0x3c3   :  { %909 = vpow2.f32 %v309_v60 }
 0x3c9   :  { %v908_v61 = vpop.eup %907 }
 0x3ca   :  { %v311_v62 = vsel %vm129_vm3, %v908_v61, 0.0 }
 0x3cb   :  { %312 = vadd.xlane.f32.xlu0 %v311_v62 }
 0x3cd   :  { %v910_v63 = vpop.eup %909 }
 0x3ce   :  { %v314_v1 = vsel %vm301_vm6, %v910_v63, 0.0 }
 0x3cf   :  { %315 = vadd.xlane.f32.xlu1 %v314_v1 }
 0x458   :  { %v313_v2 = vpop.xlane.xlu0 %312 }
 0x459   :  { %911 = vrcp.f32 %v313_v2  ;;  %v37_v2 = vld [vmem:[%s1106_s0 + $0x20] sm:$0xf]  ;;  %s979_s0 = smov [#allocation5]  }
 0x45a   :  { %vm571_vm11 = vcmp.gt.bf16.partialorder %v37_v2, 0  ;;  %s766_s7 = sshll.u32 %s979_s0, 4  ;;  %s767_s7 = int_to_ptr.vmem [resolvable:$true] %s766_s7 }
 0x45b   :  { %s945_s8 = scalar_lea.vmem %s767_s7, 128  ;;  %p950_p9 = scmp.lt.s32.totalorder %s767_s7, %s767_s7 }
 0x45c   :  { %v316_v3 = vpop.xlane.xlu1 %315  ;;  %p946_p8 = scmp.ne.s32.totalorder %s767_s7, %s945_s8  ;;  %p951_p10 = scmp.lt.s32.totalorder %s945_s8, %s945_s8 }
 0x45d   :  { %913 = vrcp.f32 %v316_v3  ;;  %v573_v3 = vsel %vm571_vm11, 65537, %v977_v50  ;;  %vm639_vm11 = vcmask 1046528  }
 0x45e   :  { %p952_p11 = por %p951_p10, %p950_p9 }
 0x460   :  { %p953_p12 = pnand %p952_p11, %p946_p8 }
 0x463   :  { %v912_v4 = vpop.eup %911 }
 0x464   :  { %v319_v6 = vmul.f32 %v912_v4, %v908_v61  ;;  %v575_v4 = vunpack.c.l.b16 %v573_v3 }
 0x466   :  { %vm577_vm12 = vcmp.ne.s32.totalorder %v575_v4, 0 }
 0x467   :  { %v914_v5 = vpop.eup %913 }
 0x468   :  { %v320_v7 = vmul.f32 %v914_v5, %v910_v63  ;;  %v579_v5 = vsel %vm577_vm12, 1, %v977_v50  ;;  %vm715_vm12 = vcmask 261120  }
 0x46a   :  { %v321_v8 = vpack.c.bf16 %v320_v7, %v319_v6 }
 0x46c   :  { %851 = vmatmul.mubr.msk.bf16.vlgmr.msra.gmra.mrb[8].mxu0 %vm129_vm3, %v321_v8 }
 0x46d   :  { %862 = vmatprep.mubr.msk.bf16.mxu0 %vm975_vm0, %v974_v0 }
 0x53f   :  { %v368_v12 = vpop.f32.mrb[8].mxu0 }
 0x540   :  { %v369_v13 = vadd.f32 %v368_v12, %v327_v11  ;;  %v852_v15 = vpop.f32.mrb[9].mxu0 }
 0x541   :  { %v371_v17 = vpop.f32.mrb[10].mxu0 }
 0x542   :  { %v372_v18 = vadd.f32 %v371_v17, %v327_v11  ;;  %v853_v19 = vpop.f32.mrb[11].mxu0  ;;  %v375_v20 = vmax.f32 %v369_v13, 0.0 }
 0x543   :  { %v904_v19 = vld [vmem:[#allocation2 + $0x18] sm:$0xff]  }
 0x544   :  { %v376_v21 = vmax.f32 %v372_v18, 0.0 }
 0x546   :  { %v377_v22 = vpack.c.bf16 %v376_v21, %v375_v20  ;;  %v905_v20 = vld [vmem:[#allocation2 + $0x20] sm:$0xff]  }
 0x548   :  { %857 = vmatmul.mubr.msk.bf16.vlgmr.msra.gmra.mrb[8].mxu1 %vm73_vm1, %v377_v22  ;;  %v385_v23 = vsel %vm73_vm1, %v377_v22, 0  ;;  %v55_v22 = vld [vmem:[#allocation2 + $0x50] ss:$8 sps:$4 sm:$0xff]  }
 0x549   :  { %861 = vmatpush3.bf16.xpose.msra.mxu0 %v385_v23  ;;  %868 = vmatprep.mubr.msk.bf16.mxu1 %vm975_vm0, %v974_v0 }
 0x54a   :  { %872 = vmatprep.subr.bf16.mxu0 %v974_v0 }
 0x550   :  { %863 = vmatmul.mubr.msk.bf16.vlgmr.msra.gmra.mrb[12].mxu0 %vm73_vm1, %v54_v14  ;;  %v519_v14 = vunpack.c.l.bf16 %v55_v22 }
 0x551   :  { %874 = vmatprep.mubr.msk.bf16.mxu0 %vm975_vm0, %v974_v0  ;;  %873 = vmatpush3.bf16.msra.mxu0 %v904_v19 }
 0x61b   :  { %v421_v24 = vpop.f32.mrb[8].mxu1 }
 0x61c   :  { %473 = vperm.xlu1 %896, %v421_v24   ;;  %v858_v25 = vpop.f32.mrb[9].mxu1 }
 0x61d   :  { %v424_v26 = vpop.f32.mrb[10].mxu1 }
 0x61e   :  { %v518_v27 = vpack.c.bf16 %v424_v26, %v421_v24  ;;  %v859_v28 = vpop.f32.mrb[11].mxu1  ;;  %v523_v24 = vrot.slane %v519_v14, %v1032_v16 }
 0x620   :  { %478 = vperm.xlu1 %896, %v424_v26   ;;  %v528_v29 = vsel %vm133_vm2, %v518_v27, 0 }
 0x621   :  { %867 = vmatpush3.bf16.msra.mxu1 %v528_v29 }
 0x622   :  { %878 = vmatprep.subr.bf16.mxu1 %v974_v0 }
 0x623   :  { %v465_v30 = vpop.f32.mrb[12].mxu0 }
 0x624   :  { %v864_v31 = vpop.f32.mrb[13].mxu0  ;;  %v484_v35 = vrot.slane %v465_v30, %v1032_v16  ;;  %898 = vset.pattern.permute.xlu1 %v977_v50 }
 0x625   :  { %v468_v32 = vpop.f32.mrb[14].mxu0 }
 0x626   :  { %v865_v33 = vpop.f32.mrb[15].mxu0 }
 0x69b   :  { %v474_v37 = vpop.permute.xlu1 %473 }
 0x69c   :  { %v485_v38 = vadd.f32 %v484_v35, %v474_v37 }
 0x69e   :  { %v487_v39 = vadd.f32 %v799_v36, %v485_v38 }
 0x69f   :  { %v479_v41 = vpop.permute.xlu1 %478 }
 0x6a0   :  { %v486_v42 = vadd.f32 %v484_v35, %v479_v41  ;;  %vm489_vm7 = vcmp.gt.f32.partialorder %v487_v39, 0.0  ;;  %v491_v43 = vmul.f32 0.2, %v487_v39 }
 0x6a2   :  { %v488_v44 = vadd.f32 %v800_v40, %v486_v42  ;;  %v493_v45 = vsel %vm489_vm7, %v487_v39, %v491_v43  ;;  %vm630_vm7 = vcmask 1041408  }
 0x6a3   :  { %v495_v46 = vsel %vm129_vm3, %v493_v45, -inf }
 0x6a4   :  { %496 = vmax.xlane.f32.xlu1 %v495_v46  ;;  %vm490_vm8 = vcmp.gt.f32.partialorder %v488_v44, 0.0  ;;  %v492_v47 = vmul.f32 0.2, %v488_v44 }
 0x6a6   :  { %v494_v48 = vsel %vm490_vm8, %v488_v44, %v492_v47  ;;  %vm632_vm8 = vcmask 1042432  }
 0x6a7   :  { %v498_v49 = vsel %vm301_vm6, %v494_v48, -inf }
 0x6a8   :  { %499 = vmax.xlane.f32.xlu0 %v498_v49 }
 0x6b5   :  { %603 = vrot.lane.b32.xlu1 %v580_v54, %s978_s4 }
 0x731   :  { %v497_v55 = vpop.xlane.xlu1 %496 }
 0x732   :  { %v501_v56 = vsub.f32 %v493_v45, %v497_v55 }
 0x734   :  { %v503_v57 = vmul.f32 1.442695, %v501_v56 }
 0x735   :  { %v500_v58 = vpop.xlane.xlu0 %499  ;;  %v604_v6 = vpop.permute.xlu1 %603 }
 0x736   :  { %915 = vpow2.f32 %v503_v57  ;;  %v502_v59 = vsub.f32 %v494_v48, %v500_v58  ;;  %vm606_vm13 = vcmp.ne.s32.totalorder %v604_v6, 0 }
 0x737   :  { %v608_v7 = vsel %vm606_vm13, 1, %v977_v50 }
 0x738   :  { %v505_v60 = vmul.f32 1.442695, %v502_v59  ;;  %613 = vperm.xlu1 %898, %v608_v7  }
 0x73a   :  { %917 = vpow2.f32 %v505_v60 }
 0x740   :  { %v916_v61 = vpop.eup %915 }
 0x741   :  { %v507_v62 = vsel %vm129_vm3, %v916_v61, 0.0 }
 0x742   :  { %508 = vadd.xlane.f32.xlu0 %v507_v62  ;;  %v906_v62 = vld [vmem:[#allocation2 + $0x28] sm:$0xff]  }
 0x744   :  { %v918_v63 = vpop.eup %917 }
 0x745   :  { %v510_v1 = vsel %vm301_vm6, %v918_v63, 0.0  ;;  %vm628_vm6 = vcmask 1040384  }
 0x746   :  { %511 = vadd.xlane.f32.xlu0 %v510_v1 }
 0x75c   :  { %601 = vrot.lane.b32.xlu0 %v579_v5, %s978_s4 }
 0x760   :  { %582 = vperm.xlu0 %897, %v579_v5  }
 0x764   :  { %585 = vperm.xlu0 %897, %v580_v54  }
 0x7b7   :  { %v614_v26 = vpop.permute.xlu1 %613 }
 0x7cf   :  { %v509_v8 = vpop.xlane.xlu0 %508 }
 0x7d0   :  { %919 = vrcp.f32 %v509_v8 }
 0x7d3   :  { %v512_v9 = vpop.xlane.xlu0 %511 }
 0x7d4   :  { %921 = vrcp.f32 %v512_v9  ;;  %v57_v9 = vld [vmem:[#allocation2 + $0x60] sm:$0xf] }
 0x7d7   :  { %v602_v10 = vpop.permute.xlu0 %601 }
 0x7d8   :  { %vm605_vm14 = vcmp.ne.s32.totalorder %v602_v10, 0  ;;  %v698_v10 = vunpack.c.l.bf16 %v57_v9 }
 0x7d9   :  { %v607_v11 = vsel %vm605_vm14, 1, %v977_v50 }
 0x7da   :  { %610 = vperm.xlu0 %897, %v607_v11   ;;  %v920_v12 = vpop.eup %919  ;;  %v702_v11 = vrot.slane %v698_v10, %v1032_v16 }
 0x7db   :  { %v515_v15 = vmul.f32 %v920_v12, %v916_v61 }
 0x7de   :  { %v922_v13 = vpop.eup %921 }
 0x7df   :  { %v516_v17 = vmul.f32 %v922_v13, %v918_v63  ;;  %v583_v21 = vpop.permute.xlu0 %582  ;;  %v642_v63 = vunpack.c.h.bf16 %v55_v22 }
 0x7e0   :  { %vm587_vm15 = vcmp.eq.s32.totalorder %v583_v21, 1 }
 0x7e1   :  { %v517_v18 = vpack.c.bf16 %v516_v17, %v515_v15  ;;  %v646_v1 = vrot.slane %v642_v63, %v1032_v16 }
 0x7e3   :  { %869 = vmatmul.mubr.msk.bf16.vlgmr.msra.gmra.mrb[12].mxu1 %vm129_vm3, %v517_v18  ;;  %v586_v23 = vpop.permute.xlu0 %585 }
 0x7e4   :  { %882 = vmatprep.mubr.msk.bf16.mxu1 %vm975_vm0, %v974_v0  ;;  %879 = vmatpush3.bf16.msra.mxu1 %v905_v20  ;;  %vm616_vm0 = vcmp.eq.s32.totalorder %v614_v26, 1  ;;  %vm588_vm5 = vcmp.eq.s32.totalorder %v586_v23, 1 }
 0x7e5   :  { %880 = vmatprep.subr.bf16.mxu1 %v974_v0 }
 0x7e8   :  { %881 = vmatpush3.bf16.msra.mxu1 %v906_v62 }
 0x859   :  { %v611_v25 = vpop.permute.xlu0 %610 }
 0x85a   :  { %vm615_vm3 = vcmp.eq.s32.totalorder %v611_v25, 1 }
 0x8b6   :  { %v564_v27 = vpop.f32.mrb[12].mxu1 }
 0x8b7   :  { %v565_v28 = vadd.f32 %v564_v27, %v523_v24  ;;  %v870_v29 = vpop.f32.mrb[13].mxu1 }
 0x8b8   :  { %v567_v30 = vpop.f32.mrb[14].mxu1 }
 0x8b9   :  { %v589_v31 = vsel %vm587_vm15, %v565_v28, -1e+30  ;;  %v617_v32 = vsel %vm615_vm3, %v565_v28, -1e+30  ;;  %v568_v33 = vadd.f32 %v567_v30, %v523_v24  ;;  %v871_v34 = vpop.f32.mrb[15].mxu1 }
 0x8ba   :  { %v591_v36 = vsel %vm73_vm1, %v589_v31, -inf  ;;  %v619_v37 = vsel %vm73_vm1, %v617_v32, -inf }
 0x8bb   :  { %v590_v0 = vsel %vm588_vm5, %v568_v33, -1e+30  ;;  %v618_v35 = vsel %vm616_vm0, %v568_v33, -1e+30 }
 0x8bc   :  { %v593_v38 = vsel %vm592_vm4, %v590_v0, -inf  ;;  %v620_v39 = vsel %vm592_vm4, %v618_v35, -inf }
 0x8bd   :  { %v594_v40 = vmax.f32 %v591_v36, %v593_v38  ;;  %v621_v41 = vmax.f32 %v619_v37, %v620_v39 }
 0x8bf   :  { %v595_v42 = vrot.slane %v594_v40, 4  ;;  %v622_v43 = vrot.slane %v621_v41, 4 }
 0x8c1   :  { %v596_v44 = vmax.f32 %v594_v40, %v595_v42  ;;  %v623_v45 = vmax.f32 %v621_v41, %v622_v43 }
 0x8c3   :  { %v597_v46 = vrot.slane %v596_v44, 2  ;;  %v624_v47 = vrot.slane %v623_v45, 2 }
 0x8c5   :  { %v598_v48 = vmax.f32 %v596_v44, %v597_v46  ;;  %v625_v49 = vmax.f32 %v623_v45, %v624_v47 }
 0x8c7   :  { %v599_v50 = vrot.slane %v598_v48, 1  ;;  %v626_v51 = vrot.slane %v625_v49, 1 }
 0x8c9   :  { %v600_v52 = vmax.f32 %v598_v48, %v599_v50  ;;  %v627_v53 = vmax.f32 %v625_v49, %v626_v51 }
 0x8cb   :  { %v629_v54 = vsel %vm628_vm6, %v600_v52, %v627_v53 }
 0x8cc   :  { %v631_v55 = vsel %vm630_vm7, %v629_v54, 0.0 }
 0x8cd   :  { %v633_v56 = vsel %vm632_vm8, %v631_v55, 0.0 }
 0x8ce   :  { %v635_v57 = vsel %vm634_vm9, %v633_v56, 0.0 }
 0x8cf   :  { %v637_v58 = vsel %vm636_vm10, %v635_v57, 0.0 }
 0x8d0   :  { %v638_v59 = vsel %vm133_vm2, %v637_v58, 0.0 }
 0x8d1   :  { %v640_v60 = vsel %vm639_vm11, %v638_v59, 0.0 }
 0x8d2   :  { %v641_v61 = vpack.c.bf16 %v640_v60, %v640_v60 }
 0x8d4   :  { %875 = vmatmul.mubr.msk.bf16.vlgmr.msra.gmra.mrb[16].mxu0 %vm73_vm1, %v641_v61 }
 0x9a7   :  { %v690_v2 = vpop.f32.mrb[16].mxu0 }
 0x9a8   :  { %v691_v3 = vadd.f32 %v690_v2, %v646_v1  ;;  %v876_v4 = vpop.f32.mrb[17].mxu0 }
 0x9a9   :  { %v693_v5 = vpop.f32.mrb[18].mxu0 }
 0x9aa   :  { %v696_v6 = vmax.f32 %v691_v3, 0.0  ;;  %v877_v7 = vpop.f32.mrb[19].mxu0 }
 0x9ac   :  { %v697_v8 = vpack.c.bf16 %v696_v6, %v696_v6 }
 0x9ae   :  { %883 = vmatmul.mubr.msk.bf16.vlgmr.msra.gmra.mrb[16].mxu1 %vm715_vm12, %v697_v8 }
 0xa81   :  { %v753_v12 = vpop.f32.mrb[16].mxu1 }
 0xa82   :  { %v754_v13 = vadd.f32 %v753_v12, %v702_v11  ;;  %v884_v15 = vpop.f32.mrb[17].mxu1 }
 0xa83   :  { %v756_v17 = vpop.f32.mrb[18].mxu1 }
 0xa84   :  { %759 = vst [vmem:[#allocation5] sm:$0xff] %v754_v13  ;;  %v885_v18 = vpop.f32.mrb[19].mxu1 }
 0xa85   :  { %956 = shalt.err (!%p953_p12)
}
 0xa86   :  { %s957_s11 = scalar_lea.hbm %s1108_s2, 128 }
 0xa87   :  { %p958_p13 = scmp.ne.s32.totalorder %s1108_s2, %s957_s11  ;;  %p961_p0 = scmp.lt.u32.totalorder %s957_s11, %s1108_s2 }
 0xa89   :  { %p963_p1 = pnand %p961_p0, %p958_p13 }
 0xa8b   :  { %966 = shalt.err (!%p963_p1)
}
 0xa8c   :  { %769 = dma.vmem_to_hbm [thread:$0]  %s767_s7, 128, %s1108_s2, [#allocation4]  }
 0xa8d   :  { %969 = dma.done.wait [#allocation4], 128  }
 0xa8e   :  { %970 = vsyncadd [#allocation4], 4294967168 }
 0xa8f   :  { %773 = vsyncpa [#allocation3], 1 }
 0xa90   :  { %774 = vsyncpa [#allocation4], 1 }

</bundles_post_ra>
